<compile_context>
chip_gen: v7x
topology: tpu7x:2x2x1
jax: 0.10.0
libtpu: 0.0.40
codegen_flags: <defaults>
</compile_context>

<pallas_src>
import functools

import jax
import jax.numpy as jnp
from jax.experimental import pallas as pl
from jax.experimental.pallas import tpu as pltpu


def ffm_kernel(x1_ref, x2_ref, hidx_ref, widx_ref, wc_ref, shift_ref,
               w1_ref, b1_ref, w2_ref, b2_ref, out_ref, patches_ref, *, H, W):
    Cout, HW = out_ref.shape
    C_each = x1_ref.shape[0]
    Cin = 2 * C_each

    x1 = x1_ref[...]                       # (C_each, H*W)
    x2 = x2_ref[...]                       # (C_each, H*W)
    h_idx = hidx_ref[...]                  # (1, H*W) int32: spatial row per lane
    w_idx = widx_ref[...]                  # (1, H*W) int32: spatial col per lane

    # --- im2col: 9 shifted + halo-masked taps written into a VMEM scratch ----
    # A spatial shift (dy, dx) of the flattened (C, H*W) map is a lane rotation
    # by -(dy*W + dx) (XLU slot) plus a mask that zeroes out-of-image taps.
    for ky in range(3):
        for kx in range(3):
            dy, dx = ky - 1, kx - 1
            off = dy * W + dx
            if off == 0:
                s1, s2 = x1, x2
            else:
                amt = (-off) % HW
                r1 = pltpu.roll(x1, amt, axis=1)
                r2 = pltpu.roll(x2, amt, axis=1)
                cond = None
                if dy == -1:
                    cond = h_idx >= 1
                elif dy == 1:
                    cond = h_idx < H - 1
                if dx == -1:
                    cw = w_idx >= 1
                    cond = cw if cond is None else jnp.logical_and(cond, cw)
                elif dx == 1:
                    cw = w_idx < W - 1
                    cond = cw if cond is None else jnp.logical_and(cond, cw)
                maskf = jnp.where(cond, 1.0, 0.0)          # (1, H*W) float32
                s1 = r1 * maskf
                s2 = r2 * maskf
            base = (ky * 3 + kx) * Cin                     # torch.cat channel order
            patches_ref[base:base + C_each, :] = s1
            patches_ref[base + C_each:base + Cin, :] = s2

    # --- 3x3 conv (+ folded BN scale) as ONE lane-dense matmul ---------------
    acc = jnp.dot(wc_ref[...], patches_ref[...],
                  preferred_element_type=jnp.float32)      # (Cout, H*W)
    feat = jnp.maximum(acc + shift_ref[...], 0.0)          # BN shift + ReLU

    # --- SE path: avg-pool -> 1x1 conv + ReLU -> 1x1 conv + sigmoid ----------
    pooled = jnp.mean(feat, axis=1, keepdims=True)         # (Cout, 1)
    pooled_b = jnp.broadcast_to(pooled, (Cout, HW))        # lane-replicated
    h1 = jnp.maximum(
        jnp.dot(w1_ref[...], pooled_b, preferred_element_type=jnp.float32)
        + b1_ref[...], 0.0)
    s = jnp.dot(w2_ref[...], h1, preferred_element_type=jnp.float32) + b2_ref[...]
    attn = 1.0 / (1.0 + jnp.exp(-s))                       # (Cout, H*W)

    # feature * attn + feature == feature * (attn + 1)
    out_ref[...] = (feat * (attn + 1.0)).astype(out_ref.dtype)


def feature_fusion_forward(input_1, input_2, params):
    """input_1, input_2: NCHW float32 (the two halves of torch.cat). Returns NCHW."""
    N, C_each, H, W = input_1.shape
    Cin = 2 * C_each
    Cout = params["conv_w"].shape[-1]
    HW = H * W

    # Flat spatial views: free reshapes of contiguous NCHW data (no HBM copies,
    # no transpose, no pad, no concat before the kernel).
    x1 = input_1.reshape(N, C_each, HW)
    x2 = input_2.reshape(N, C_each, HW)

    # Fold eval-mode BatchNorm scale into the conv weights; keep only the shift.
    # TODO(synk): training-mode BatchNorm (batch statistics) is not reproduced.
    eps = 1e-5
    scale = params["bn_gamma"] / jnp.sqrt(params["bn_var"] + eps)       # (Cout,)
    shift = (params["bn_beta"] - params["bn_mean"] * scale).reshape(Cout, 1)
    # (Cout, 9*Cin): column = (ky*3+kx)*Cin + ci, matching the in-kernel im2col.
    wc = (jnp.transpose(params["conv_w"], (3, 0, 1, 2)).reshape(Cout, 9 * Cin)
          * scale[:, None])

    w1 = params["conv1_w"]                       # (Cout, Cout), torch [out, in]
    b1 = params["conv1_b"].reshape(Cout, 1)
    w2 = params["conv2_w"]
    b2 = params["conv2_b"].reshape(Cout, 1)

    lane = jnp.arange(HW, dtype=jnp.int32)
    h_idx = (lane // W).reshape(1, HW)
    w_idx = (lane % W).reshape(1, HW)

    kernel = functools.partial(ffm_kernel, H=H, W=W)

    # TODO(synk): for production H*W, add a spatial grid axis with a two-pass
    # structure (pool/attn pass, then apply pass) -- the global average pool
    # couples all spatial tiles -- and size tiles for 64 MiB VMEM on v7x.
    out_flat = pl.pallas_call(
        kernel,
        out_shape=jax.ShapeDtypeStruct((N, Cout, HW), input_1.dtype),
        grid=(N,),
        in_specs=[
            pl.BlockSpec((None, C_each, HW), lambda n: (n, 0, 0)),
            pl.BlockSpec((None, C_each, HW), lambda n: (n, 0, 0)),
            pl.BlockSpec((1, HW), lambda n: (0, 0)),
            pl.BlockSpec((1, HW), lambda n: (0, 0)),
            pl.BlockSpec((Cout, 9 * Cin), lambda n: (0, 0)),
            pl.BlockSpec((Cout, 1), lambda n: (0, 0)),
            pl.BlockSpec((Cout, Cout), lambda n: (0, 0)),
            pl.BlockSpec((Cout, 1), lambda n: (0, 0)),
            pl.BlockSpec((Cout, Cout), lambda n: (0, 0)),
            pl.BlockSpec((Cout, 1), lambda n: (0, 0)),
        ],
        out_specs=pl.BlockSpec((None, Cout, HW), lambda n: (n, 0, 0)),
        scratch_shapes=[pltpu.VMEM((9 * Cin, HW), jnp.float32)],
        compiler_params=pltpu.CompilerParams(
            dimension_semantics=("parallel",)),
    )(x1, x2, h_idx, w_idx, wc, shift, w1, b1, w2, b2)

    return out_flat.reshape(N, Cout, H, W)


def reference_forward(input_1, input_2, params):
    """Pure-JAX reference (same semantics) for a sanity check."""
    x = jnp.concatenate([input_1, input_2], axis=1)
    x_nhwc = jnp.transpose(x, (0, 2, 3, 1))
    feat = jax.lax.conv_general_dilated(
        x_nhwc, params["conv_w"], window_strides=(1, 1), padding="SAME",
        dimension_numbers=("NHWC", "HWIO", "NHWC"))
    eps = 1e-5
    scale = params["bn_gamma"] / jnp.sqrt(params["bn_var"] + eps)
    shift = params["bn_beta"] - params["bn_mean"] * scale
    feat = jnp.maximum(feat * scale + shift, 0.0)
    pooled = jnp.mean(feat, axis=(1, 2), keepdims=True)          # (N,1,1,C)
    h = jnp.maximum(jnp.einsum("nhwc,oc->nhwo", pooled, params["conv1_w"])
                    + params["conv1_b"], 0.0)
    attn = jax.nn.sigmoid(jnp.einsum("nhwc,oc->nhwo", h, params["conv2_w"])
                          + params["conv2_b"])
    out = feat * attn + feat
    return jnp.transpose(out, (0, 3, 1, 2))


def init_params(key, in_channels, num_classes):
    ks = jax.random.split(key, 8)
    return {
        # 3x3 conv, HWIO, bias=False
        "conv_w": 0.1 * jax.random.normal(ks[0], (3, 3, in_channels, num_classes), jnp.float32),
        # BatchNorm2d(num_classes) — deterministic, non-trivial running stats
        "bn_gamma": 1.0 + 0.1 * jax.random.normal(ks[1], (num_classes,), jnp.float32),
        "bn_beta": 0.1 * jax.random.normal(ks[2], (num_classes,), jnp.float32),
        "bn_mean": 0.1 * jax.random.normal(ks[3], (num_classes,), jnp.float32),
        "bn_var": jnp.abs(1.0 + 0.1 * jax.random.normal(ks[4], (num_classes,), jnp.float32)),
        # 1x1 convs, PyTorch layout (Cout, Cin)
        "conv1_w": 0.2 * jax.random.normal(ks[5], (num_classes, num_classes), jnp.float32),
        "conv1_b": 0.05 * jax.random.normal(ks[6], (num_classes,), jnp.float32),
        "conv2_w": 0.2 * jax.random.normal(ks[7], (num_classes, num_classes), jnp.float32),
        "conv2_b": jnp.zeros((num_classes,), jnp.float32),
    }


if __name__ == "__main__":
    N, C_each, H, W = 2, 4, 16, 16
    in_channels = 2 * C_each          # channels after torch.cat
    num_classes = 4

    key = jax.random.PRNGKey(0)
    k1, k2, kp = jax.random.split(key, 3)
    input_1 = jax.random.normal(k1, (N, C_each, H, W), jnp.float32)
    input_2 = jax.random.normal(k2, (N, C_each, H, W), jnp.float32)
    params = init_params(kp, in_channels, num_classes)

    out = feature_fusion_forward(input_1, input_2, params)
    out = jax.block_until_ready(out)

    ref = reference_forward(input_1, input_2, params)
    assert out.shape == (N, num_classes, H, W)
    assert jnp.allclose(out, ref, atol=2e-4, rtol=2e-4)

    print("KERNEL_OK")
</pallas_src>

<mosaic_0001>
module attributes {stable_mosaic.version = 11 : i64} {
  func.func @ffm_kernel(%arg0: i32, %arg1: memref<1x4x256xf32, #tpu.memory_space<vmem>>, %arg2: memref<1x4x256xf32, #tpu.memory_space<vmem>>, %arg3: memref<1x256xi32, #tpu.memory_space<vmem>>, %arg4: memref<1x256xi32, #tpu.memory_space<vmem>>, %arg5: memref<4x72xf32, #tpu.memory_space<vmem>>, %arg6: memref<4x1xf32, #tpu.memory_space<vmem>>, %arg7: memref<4x4xf32, #tpu.memory_space<vmem>>, %arg8: memref<4x1xf32, #tpu.memory_space<vmem>>, %arg9: memref<4x4xf32, #tpu.memory_space<vmem>>, %arg10: memref<4x1xf32, #tpu.memory_space<vmem>>, %arg11: memref<1x4x256xf32, #tpu.memory_space<vmem>>, %arg12: memref<72x256xf32, #tpu.memory_space<vmem>>) attributes {dimension_semantics = [#tpu.dimension_semantics<parallel>], iteration_bounds = array<i64: 2>, scalar_prefetch = 0 : i64, scratch_operands = 1 : i64, tpu.core_type = #tpu.core_type<tc>, window_params = [{transform_indices = @transform_0, window_bounds = array<i64: 1, 4, 256>}, {transform_indices = @transform_1, window_bounds = array<i64: 1, 4, 256>}, {pipeline_mode = #tpu.pipeline_mode<synchronous>, transform_indices = @transform_2, window_bounds = array<i64: 1, 256>}, {pipeline_mode = #tpu.pipeline_mode<synchronous>, transform_indices = @transform_3, window_bounds = array<i64: 1, 256>}, {pipeline_mode = #tpu.pipeline_mode<synchronous>, transform_indices = @transform_4, window_bounds = array<i64: 4, 72>}, {pipeline_mode = #tpu.pipeline_mode<synchronous>, transform_indices = @transform_5, window_bounds = array<i64: 4, 1>}, {pipeline_mode = #tpu.pipeline_mode<synchronous>, transform_indices = @transform_6, window_bounds = array<i64: 4, 4>}, {pipeline_mode = #tpu.pipeline_mode<synchronous>, transform_indices = @transform_7, window_bounds = array<i64: 4, 1>}, {pipeline_mode = #tpu.pipeline_mode<synchronous>, transform_indices = @transform_8, window_bounds = array<i64: 4, 4>}, {pipeline_mode = #tpu.pipeline_mode<synchronous>, transform_indices = @transform_9, window_bounds = array<i64: 4, 1>}, {transform_indices = @transform_10, window_bounds = array<i64: 1, 4, 256>}]} {
    %c0 = arith.constant 0 : index
    %c0_0 = arith.constant 0 : index
    %c0_1 = arith.constant 0 : index
    %0 = vector.load %arg1[%c0, %c0_0, %c0_1] : memref<1x4x256xf32, #tpu.memory_space<vmem>>, vector<1x4x256xf32>
    %1 = vector.shape_cast %0 : vector<1x4x256xf32> to vector<4x256xf32>
    %c0_2 = arith.constant 0 : index
    %c0_3 = arith.constant 0 : index
    %c0_4 = arith.constant 0 : index
    %2 = vector.load %arg2[%c0_2, %c0_3, %c0_4] : memref<1x4x256xf32, #tpu.memory_space<vmem>>, vector<1x4x256xf32>
    %3 = vector.shape_cast %2 : vector<1x4x256xf32> to vector<4x256xf32>
    %c0_5 = arith.constant 0 : index
    %c0_6 = arith.constant 0 : index
    %4 = vector.load %arg3[%c0_5, %c0_6] : memref<1x256xi32, #tpu.memory_space<vmem>>, vector<1x256xi32>
    %c0_7 = arith.constant 0 : index
    %c0_8 = arith.constant 0 : index
    %5 = vector.load %arg4[%c0_7, %c0_8] : memref<1x256xi32, #tpu.memory_space<vmem>>, vector<1x256xi32>
    %c17_i32 = arith.constant 17 : i32
    %6 = tpu.dynamic_rotate %1 by %c17_i32 dim 1 : vector<4x256xf32>, i32 -> vector<4x256xf32>
    %c17_i32_9 = arith.constant 17 : i32
    %7 = tpu.dynamic_rotate %3 by %c17_i32_9 dim 1 : vector<4x256xf32>, i32 -> vector<4x256xf32>
    %c1_i32 = arith.constant 1 : i32
    %8 = vector.broadcast %c1_i32 : i32 to vector<1x256xi32>
    %9 = arith.cmpi sge, %4, %8 : vector<1x256xi32>
    %c1_i32_10 = arith.constant 1 : i32
    %10 = vector.broadcast %c1_i32_10 : i32 to vector<1x256xi32>
    %11 = arith.cmpi sge, %5, %10 : vector<1x256xi32>
    %12 = arith.andi %9, %11 : vector<1x256xi1>
    %cst = arith.constant 1.000000e+00 : f32
    %cst_11 = arith.constant 0.000000e+00 : f32
    %13 = vector.broadcast %cst : f32 to vector<1x256xf32>
    %14 = vector.broadcast %cst_11 : f32 to vector<1x256xf32>
    %15 = arith.select %12, %13, %14 : vector<1x256xi1>, vector<1x256xf32>
    %16 = vector.broadcast %15 : vector<1x256xf32> to vector<4x256xf32>
    %17 = arith.mulf %6, %16 : vector<4x256xf32>
    %18 = vector.broadcast %15 : vector<1x256xf32> to vector<4x256xf32>
    %19 = arith.mulf %7, %18 : vector<4x256xf32>
    %c0_12 = arith.constant 0 : index
    %c0_13 = arith.constant 0 : index
    %20 = vector.load %arg12[%c0_12, %c0_13] : memref<72x256xf32, #tpu.memory_space<vmem>>, vector<4x256xf32>
    tpu.vector_store %arg12[%c0_12, %c0_13], %17 {strides = array<i32>} : memref<72x256xf32, #tpu.memory_space<vmem>>, vector<4x256xf32>,
    %c4 = arith.constant 4 : index
    %c0_14 = arith.constant 0 : index
    %21 = vector.load %arg12[%c4, %c0_14] : memref<72x256xf32, #tpu.memory_space<vmem>>, vector<4x256xf32>
    tpu.vector_store %arg12[%c4, %c0_14], %19 {strides = array<i32>} : memref<72x256xf32, #tpu.memory_space<vmem>>, vector<4x256xf32>,
    %c16_i32 = arith.constant 16 : i32
    %22 = tpu.dynamic_rotate %1 by %c16_i32 dim 1 : vector<4x256xf32>, i32 -> vector<4x256xf32>
    %c16_i32_15 = arith.constant 16 : i32
    %23 = tpu.dynamic_rotate %3 by %c16_i32_15 dim 1 : vector<4x256xf32>, i32 -> vector<4x256xf32>
    %c1_i32_16 = arith.constant 1 : i32
    %24 = vector.broadcast %c1_i32_16 : i32 to vector<1x256xi32>
    %25 = arith.cmpi sge, %4, %24 : vector<1x256xi32>
    %cst_17 = arith.constant 1.000000e+00 : f32
    %cst_18 = arith.constant 0.000000e+00 : f32
    %26 = vector.broadcast %cst_17 : f32 to vector<1x256xf32>
    %27 = vector.broadcast %cst_18 : f32 to vector<1x256xf32>
    %28 = arith.select %25, %26, %27 : vector<1x256xi1>, vector<1x256xf32>
    %29 = vector.broadcast %28 : vector<1x256xf32> to vector<4x256xf32>
    %30 = arith.mulf %22, %29 : vector<4x256xf32>
    %31 = vector.broadcast %28 : vector<1x256xf32> to vector<4x256xf32>
    %32 = arith.mulf %23, %31 : vector<4x256xf32>
    %c8 = arith.constant 8 : index
    %c0_19 = arith.constant 0 : index
    %33 = vector.load %arg12[%c8, %c0_19] : memref<72x256xf32, #tpu.memory_space<vmem>>, vector<4x256xf32>
    tpu.vector_store %arg12[%c8, %c0_19], %30 {strides = array<i32>} : memref<72x256xf32, #tpu.memory_space<vmem>>, vector<4x256xf32>,
    %c12 = arith.constant 12 : index
    %c0_20 = arith.constant 0 : index
    %34 = vector.load %arg12[%c12, %c0_20] : memref<72x256xf32, #tpu.memory_space<vmem>>, vector<4x256xf32>
    tpu.vector_store %arg12[%c12, %c0_20], %32 {strides = array<i32>} : memref<72x256xf32, #tpu.memory_space<vmem>>, vector<4x256xf32>,
    %c15_i32 = arith.constant 15 : i32
    %35 = tpu.dynamic_rotate %1 by %c15_i32 dim 1 : vector<4x256xf32>, i32 -> vector<4x256xf32>
    %c15_i32_21 = arith.constant 15 : i32
    %36 = tpu.dynamic_rotate %3 by %c15_i32_21 dim 1 : vector<4x256xf32>, i32 -> vector<4x256xf32>
    %c1_i32_22 = arith.constant 1 : i32
    %37 = vector.broadcast %c1_i32_22 : i32 to vector<1x256xi32>
    %38 = arith.cmpi sge, %4, %37 : vector<1x256xi32>
    %c15_i32_23 = arith.constant 15 : i32
    %39 = vector.broadcast %c15_i32_23 : i32 to vector<1x256xi32>
    %40 = arith.cmpi slt, %5, %39 : vector<1x256xi32>
    %41 = arith.andi %38, %40 : vector<1x256xi1>
    %cst_24 = arith.constant 1.000000e+00 : f32
    %cst_25 = arith.constant 0.000000e+00 : f32
    %42 = vector.broadcast %cst_24 : f32 to vector<1x256xf32>
    %43 = vector.broadcast %cst_25 : f32 to vector<1x256xf32>
    %44 = arith.select %41, %42, %43 : vector<1x256xi1>, vector<1x256xf32>
    %45 = vector.broadcast %44 : vector<1x256xf32> to vector<4x256xf32>
    %46 = arith.mulf %35, %45 : vector<4x256xf32>
    %47 = vector.broadcast %44 : vector<1x256xf32> to vector<4x256xf32>
    %48 = arith.mulf %36, %47 : vector<4x256xf32>
    %c16 = arith.constant 16 : index
    %c0_26 = arith.constant 0 : index
    %49 = vector.load %arg12[%c16, %c0_26] : memref<72x256xf32, #tpu.memory_space<vmem>>, vector<4x256xf32>
    tpu.vector_store %arg12[%c16, %c0_26], %46 {strides = array<i32>} : memref<72x256xf32, #tpu.memory_space<vmem>>, vector<4x256xf32>,
    %c20 = arith.constant 20 : index
    %c0_27 = arith.constant 0 : index
    %50 = vector.load %arg12[%c20, %c0_27] : memref<72x256xf32, #tpu.memory_space<vmem>>, vector<4x256xf32>
    tpu.vector_store %arg12[%c20, %c0_27], %48 {strides = array<i32>} : memref<72x256xf32, #tpu.memory_space<vmem>>, vector<4x256xf32>,
    %c1_i32_28 = arith.constant 1 : i32
    %51 = tpu.dynamic_rotate %1 by %c1_i32_28 dim 1 : vector<4x256xf32>, i32 -> vector<4x256xf32>
    %c1_i32_29 = arith.constant 1 : i32
    %52 = tpu.dynamic_rotate %3 by %c1_i32_29 dim 1 : vector<4x256xf32>, i32 -> vector<4x256xf32>
    %c1_i32_30 = arith.constant 1 : i32
    %53 = vector.broadcast %c1_i32_30 : i32 to vector<1x256xi32>
    %54 = arith.cmpi sge, %5, %53 : vector<1x256xi32>
    %cst_31 = arith.constant 1.000000e+00 : f32
    %cst_32 = arith.constant 0.000000e+00 : f32
    %55 = vector.broadcast %cst_31 : f32 to vector<1x256xf32>
    %56 = vector.broadcast %cst_32 : f32 to vector<1x256xf32>
    %57 = arith.select %54, %55, %56 : vector<1x256xi1>, vector<1x256xf32>
    %58 = vector.broadcast %57 : vector<1x256xf32> to vector<4x256xf32>
    %59 = arith.mulf %51, %58 : vector<4x256xf32>
    %60 = vector.broadcast %57 : vector<1x256xf32> to vector<4x256xf32>
    %61 = arith.mulf %52, %60 : vector<4x256xf32>
    %c24 = arith.constant 24 : index
    %c0_33 = arith.constant 0 : index
    %62 = vector.load %arg12[%c24, %c0_33] : memref<72x256xf32, #tpu.memory_space<vmem>>, vector<4x256xf32>
    tpu.vector_store %arg12[%c24, %c0_33], %59 {strides = array<i32>} : memref<72x256xf32, #tpu.memory_space<vmem>>, vector<4x256xf32>,
    %c28 = arith.constant 28 : index
    %c0_34 = arith.constant 0 : index
    %63 = vector.load %arg12[%c28, %c0_34] : memref<72x256xf32, #tpu.memory_space<vmem>>, vector<4x256xf32>
    tpu.vector_store %arg12[%c28, %c0_34], %61 {strides = array<i32>} : memref<72x256xf32, #tpu.memory_space<vmem>>, vector<4x256xf32>,
    %c32 = arith.constant 32 : index
    %c0_35 = arith.constant 0 : index
    %64 = vector.load %arg12[%c32, %c0_35] : memref<72x256xf32, #tpu.memory_space<vmem>>, vector<4x256xf32>
    tpu.vector_store %arg12[%c32, %c0_35], %1 {strides = array<i32>} : memref<72x256xf32, #tpu.memory_space<vmem>>, vector<4x256xf32>,
    %c36 = arith.constant 36 : index
    %c0_36 = arith.constant 0 : index
    %65 = vector.load %arg12[%c36, %c0_36] : memref<72x256xf32, #tpu.memory_space<vmem>>, vector<4x256xf32>
    tpu.vector_store %arg12[%c36, %c0_36], %3 {strides = array<i32>} : memref<72x256xf32, #tpu.memory_space<vmem>>, vector<4x256xf32>,
    %c255_i32 = arith.constant 255 : i32
    %66 = tpu.dynamic_rotate %1 by %c255_i32 dim 1 : vector<4x256xf32>, i32 -> vector<4x256xf32>
    %c255_i32_37 = arith.constant 255 : i32
    %67 = tpu.dynamic_rotate %3 by %c255_i32_37 dim 1 : vector<4x256xf32>, i32 -> vector<4x256xf32>
    %c15_i32_38 = arith.constant 15 : i32
    %68 = vector.broadcast %c15_i32_38 : i32 to vector<1x256xi32>
    %69 = arith.cmpi slt, %5, %68 : vector<1x256xi32>
    %cst_39 = arith.constant 1.000000e+00 : f32
    %cst_40 = arith.constant 0.000000e+00 : f32
    %70 = vector.broadcast %cst_39 : f32 to vector<1x256xf32>
    %71 = vector.broadcast %cst_40 : f32 to vector<1x256xf32>
    %72 = arith.select %69, %70, %71 : vector<1x256xi1>, vector<1x256xf32>
    %73 = vector.broadcast %72 : vector<1x256xf32> to vector<4x256xf32>
    %74 = arith.mulf %66, %73 : vector<4x256xf32>
    %75 = vector.broadcast %72 : vector<1x256xf32> to vector<4x256xf32>
    %76 = arith.mulf %67, %75 : vector<4x256xf32>
    %c40 = arith.constant 40 : index
    %c0_41 = arith.constant 0 : index
    %77 = vector.load %arg12[%c40, %c0_41] : memref<72x256xf32, #tpu.memory_space<vmem>>, vector<4x256xf32>
    tpu.vector_store %arg12[%c40, %c0_41], %74 {strides = array<i32>} : memref<72x256xf32, #tpu.memory_space<vmem>>, vector<4x256xf32>,
    %c44 = arith.constant 44 : index
    %c0_42 = arith.constant 0 : index
    %78 = vector.load %arg12[%c44, %c0_42] : memref<72x256xf32, #tpu.memory_space<vmem>>, vector<4x256xf32>
    tpu.vector_store %arg12[%c44, %c0_42], %76 {strides = array<i32>} : memref<72x256xf32, #tpu.memory_space<vmem>>, vector<4x256xf32>,
    %c241_i32 = arith.constant 241 : i32
    %79 = tpu.dynamic_rotate %1 by %c241_i32 dim 1 : vector<4x256xf32>, i32 -> vector<4x256xf32>
    %c241_i32_43 = arith.constant 241 : i32
    %80 = tpu.dynamic_rotate %3 by %c241_i32_43 dim 1 : vector<4x256xf32>, i32 -> vector<4x256xf32>
    %c15_i32_44 = arith.constant 15 : i32
    %81 = vector.broadcast %c15_i32_44 : i32 to vector<1x256xi32>
    %82 = arith.cmpi slt, %4, %81 : vector<1x256xi32>
    %c1_i32_45 = arith.constant 1 : i32
    %83 = vector.broadcast %c1_i32_45 : i32 to vector<1x256xi32>
    %84 = arith.cmpi sge, %5, %83 : vector<1x256xi32>
    %85 = arith.andi %82, %84 : vector<1x256xi1>
    %cst_46 = arith.constant 1.000000e+00 : f32
    %cst_47 = arith.constant 0.000000e+00 : f32
    %86 = vector.broadcast %cst_46 : f32 to vector<1x256xf32>
    %87 = vector.broadcast %cst_47 : f32 to vector<1x256xf32>
    %88 = arith.select %85, %86, %87 : vector<1x256xi1>, vector<1x256xf32>
    %89 = vector.broadcast %88 : vector<1x256xf32> to vector<4x256xf32>
    %90 = arith.mulf %79, %89 : vector<4x256xf32>
    %91 = vector.broadcast %88 : vector<1x256xf32> to vector<4x256xf32>
    %92 = arith.mulf %80, %91 : vector<4x256xf32>
    %c48 = arith.constant 48 : index
    %c0_48 = arith.constant 0 : index
    %93 = vector.load %arg12[%c48, %c0_48] : memref<72x256xf32, #tpu.memory_space<vmem>>, vector<4x256xf32>
    tpu.vector_store %arg12[%c48, %c0_48], %90 {strides = array<i32>} : memref<72x256xf32, #tpu.memory_space<vmem>>, vector<4x256xf32>,
    %c52 = arith.constant 52 : index
    %c0_49 = arith.constant 0 : index
    %94 = vector.load %arg12[%c52, %c0_49] : memref<72x256xf32, #tpu.memory_space<vmem>>, vector<4x256xf32>
    tpu.vector_store %arg12[%c52, %c0_49], %92 {strides = array<i32>} : memref<72x256xf32, #tpu.memory_space<vmem>>, vector<4x256xf32>,
    %c240_i32 = arith.constant 240 : i32
    %95 = tpu.dynamic_rotate %1 by %c240_i32 dim 1 : vector<4x256xf32>, i32 -> vector<4x256xf32>
    %c240_i32_50 = arith.constant 240 : i32
    %96 = tpu.dynamic_rotate %3 by %c240_i32_50 dim 1 : vector<4x256xf32>, i32 -> vector<4x256xf32>
    %c15_i32_51 = arith.constant 15 : i32
    %97 = vector.broadcast %c15_i32_51 : i32 to vector<1x256xi32>
    %98 = arith.cmpi slt, %4, %97 : vector<1x256xi32>
    %cst_52 = arith.constant 1.000000e+00 : f32
    %cst_53 = arith.constant 0.000000e+00 : f32
    %99 = vector.broadcast %cst_52 : f32 to vector<1x256xf32>
    %100 = vector.broadcast %cst_53 : f32 to vector<1x256xf32>
    %101 = arith.select %98, %99, %100 : vector<1x256xi1>, vector<1x256xf32>
    %102 = vector.broadcast %101 : vector<1x256xf32> to vector<4x256xf32>
    %103 = arith.mulf %95, %102 : vector<4x256xf32>
    %104 = vector.broadcast %101 : vector<1x256xf32> to vector<4x256xf32>
    %105 = arith.mulf %96, %104 : vector<4x256xf32>
    %c56 = arith.constant 56 : index
    %c0_54 = arith.constant 0 : index
    %106 = vector.load %arg12[%c56, %c0_54] : memref<72x256xf32, #tpu.memory_space<vmem>>, vector<4x256xf32>
    tpu.vector_store %arg12[%c56, %c0_54], %103 {strides = array<i32>} : memref<72x256xf32, #tpu.memory_space<vmem>>, vector<4x256xf32>,
    %c60 = arith.constant 60 : index
    %c0_55 = arith.constant 0 : index
    %107 = vector.load %arg12[%c60, %c0_55] : memref<72x256xf32, #tpu.memory_space<vmem>>, vector<4x256xf32>
    tpu.vector_store %arg12[%c60, %c0_55], %105 {strides = array<i32>} : memref<72x256xf32, #tpu.memory_space<vmem>>, vector<4x256xf32>,
    %c239_i32 = arith.constant 239 : i32
    %108 = tpu.dynamic_rotate %1 by %c239_i32 dim 1 : vector<4x256xf32>, i32 -> vector<4x256xf32>
    %c239_i32_56 = arith.constant 239 : i32
    %109 = tpu.dynamic_rotate %3 by %c239_i32_56 dim 1 : vector<4x256xf32>, i32 -> vector<4x256xf32>
    %c15_i32_57 = arith.constant 15 : i32
    %110 = vector.broadcast %c15_i32_57 : i32 to vector<1x256xi32>
    %111 = arith.cmpi slt, %4, %110 : vector<1x256xi32>
    %c15_i32_58 = arith.constant 15 : i32
    %112 = vector.broadcast %c15_i32_58 : i32 to vector<1x256xi32>
    %113 = arith.cmpi slt, %5, %112 : vector<1x256xi32>
    %114 = arith.andi %111, %113 : vector<1x256xi1>
    %cst_59 = arith.constant 1.000000e+00 : f32
    %cst_60 = arith.constant 0.000000e+00 : f32
    %115 = vector.broadcast %cst_59 : f32 to vector<1x256xf32>
    %116 = vector.broadcast %cst_60 : f32 to vector<1x256xf32>
    %117 = arith.select %114, %115, %116 : vector<1x256xi1>, vector<1x256xf32>
    %118 = vector.broadcast %117 : vector<1x256xf32> to vector<4x256xf32>
    %119 = arith.mulf %108, %118 : vector<4x256xf32>
    %120 = vector.broadcast %117 : vector<1x256xf32> to vector<4x256xf32>
    %121 = arith.mulf %109, %120 : vector<4x256xf32>
    %c64 = arith.constant 64 : index
    %c0_61 = arith.constant 0 : index
    %122 = vector.load %arg12[%c64, %c0_61] : memref<72x256xf32, #tpu.memory_space<vmem>>, vector<4x256xf32>
    tpu.vector_store %arg12[%c64, %c0_61], %119 {strides = array<i32>} : memref<72x256xf32, #tpu.memory_space<vmem>>, vector<4x256xf32>,
    %c68 = arith.constant 68 : index
    %c0_62 = arith.constant 0 : index
    %123 = vector.load %arg12[%c68, %c0_62] : memref<72x256xf32, #tpu.memory_space<vmem>>, vector<4x256xf32>
    tpu.vector_store %arg12[%c68, %c0_62], %121 {strides = array<i32>} : memref<72x256xf32, #tpu.memory_space<vmem>>, vector<4x256xf32>,
    %c0_63 = arith.constant 0 : index
    %c0_64 = arith.constant 0 : index
    %124 = vector.load %arg5[%c0_63, %c0_64] : memref<4x72xf32, #tpu.memory_space<vmem>>, vector<4x72xf32>
    %c0_65 = arith.constant 0 : index
    %c0_66 = arith.constant 0 : index
    %125 = vector.load %arg12[%c0_65, %c0_66] : memref<72x256xf32, #tpu.memory_space<vmem>>, vector<72x256xf32>
    %cst_67 = arith.constant dense<0.000000e+00> : vector<4x256xf32>
    %126 = tpu.matmul %124, %125, %cst_67 {dimension_numbers = #tpu.dot_dimension_numbers<[1], [0], [0], [1], [0, 0, 1, 1], [], []>} : vector<4x72xf32>, vector<72x256xf32>, vector<4x256xf32> -> vector<4x256xf32>
    %c0_68 = arith.constant 0 : index
    %c0_69 = arith.constant 0 : index
    %127 = vector.load %arg6[%c0_68, %c0_69] : memref<4x1xf32, #tpu.memory_space<vmem>>, vector<4x1xf32>
    %128 = vector.broadcast %127 : vector<4x1xf32> to vector<4x256xf32>
    %129 = arith.addf %126, %128 : vector<4x256xf32>
    %cst_70 = arith.constant 0.000000e+00 : f32
    %130 = vector.broadcast %cst_70 : f32 to vector<4x256xf32>
    %131 = arith.maximumf %129, %130 : vector<4x256xf32>
    %cst_71 = arith.constant dense<0.000000e+00> : vector<4xf32>
    %132 = vector.multi_reduction <add>, %131, %cst_71 [1] : vector<4x256xf32> to vector<4xf32>
    %133 = vector.shape_cast %132 : vector<4xf32> to vector<4x1xf32>
    %cst_72 = arith.constant 2.560000e+02 : f32
    %134 = vector.broadcast %cst_72 : f32 to vector<4x1xf32>
    %135 = arith.divf %133, %134 : vector<4x1xf32>
    %136 = vector.shape_cast %135 : vector<4x1xf32> to vector<4x1xf32>
    %137 = vector.broadcast %136 : vector<4x1xf32> to vector<4x256xf32>
    %c0_73 = arith.constant 0 : index
    %c0_74 = arith.constant 0 : index
    %138 = vector.load %arg7[%c0_73, %c0_74] : memref<4x4xf32, #tpu.memory_space<vmem>>, vector<4x4xf32>
    %cst_75 = arith.constant dense<0.000000e+00> : vector<4x256xf32>
    %139 = tpu.matmul %138, %137, %cst_75 {dimension_numbers = #tpu.dot_dimension_numbers<[1], [0], [0], [1], [0, 0, 1, 1], [], []>} : vector<4x4xf32>, vector<4x256xf32>, vector<4x256xf32> -> vector<4x256xf32>
    %c0_76 = arith.constant 0 : index
    %c0_77 = arith.constant 0 : index
    %140 = vector.load %arg8[%c0_76, %c0_77] : memref<4x1xf32, #tpu.memory_space<vmem>>, vector<4x1xf32>
    %141 = vector.broadcast %140 : vector<4x1xf32> to vector<4x256xf32>
    %142 = arith.addf %139, %141 : vector<4x256xf32>
    %cst_78 = arith.constant 0.000000e+00 : f32
    %143 = vector.broadcast %cst_78 : f32 to vector<4x256xf32>
    %144 = arith.maximumf %142, %143 : vector<4x256xf32>
    %c0_79 = arith.constant 0 : index
    %c0_80 = arith.constant 0 : index
    %145 = vector.load %arg9[%c0_79, %c0_80] : memref<4x4xf32, #tpu.memory_space<vmem>>, vector<4x4xf32>
    %cst_81 = arith.constant dense<0.000000e+00> : vector<4x256xf32>
    %146 = tpu.matmul %145, %144, %cst_81 {dimension_numbers = #tpu.dot_dimension_numbers<[1], [0], [0], [1], [0, 0, 1, 1], [], []>} : vector<4x4xf32>, vector<4x256xf32>, vector<4x256xf32> -> vector<4x256xf32>
    %c0_82 = arith.constant 0 : index
    %c0_83 = arith.constant 0 : index
    %147 = vector.load %arg10[%c0_82, %c0_83] : memref<4x1xf32, #tpu.memory_space<vmem>>, vector<4x1xf32>
    %148 = vector.broadcast %147 : vector<4x1xf32> to vector<4x256xf32>
    %149 = arith.addf %146, %148 : vector<4x256xf32>
    %cst_84 = arith.constant 0.000000e+00 : f32
    %150 = vector.broadcast %cst_84 : f32 to vector<4x256xf32>
    %151 = arith.subf %150, %149 : vector<4x256xf32>
    %152 = math.exp %151 : vector<4x256xf32>
    %cst_85 = arith.constant 1.000000e+00 : f32
    %153 = vector.broadcast %cst_85 : f32 to vector<4x256xf32>
    %154 = arith.addf %153, %152 : vector<4x256xf32>
    %cst_86 = arith.constant 1.000000e+00 : f32
    %155 = vector.broadcast %cst_86 : f32 to vector<4x256xf32>
    %156 = arith.divf %155, %154 : vector<4x256xf32>
    %cst_87 = arith.constant 1.000000e+00 : f32
    %157 = vector.broadcast %cst_87 : f32 to vector<4x256xf32>
    %158 = arith.addf %156, %157 : vector<4x256xf32>
    %159 = arith.mulf %131, %158 : vector<4x256xf32>
    %c0_88 = arith.constant 0 : index
    %c0_89 = arith.constant 0 : index
    %c0_90 = arith.constant 0 : index
    %160 = vector.load %arg11[%c0_88, %c0_89, %c0_90] : memref<1x4x256xf32, #tpu.memory_space<vmem>>, vector<1x4x256xf32>
    %161 = vector.shape_cast %160 : vector<1x4x256xf32> to vector<4x256xf32>
    %162 = vector.shape_cast %159 : vector<4x256xf32> to vector<1x4x256xf32>
    tpu.vector_store %arg11[%c0_88, %c0_89, %c0_90], %162 {strides = array<i32>} : memref<1x4x256xf32, #tpu.memory_space<vmem>>, vector<1x4x256xf32>,
    return
  }
  func.func @transform_0(%arg0: i32) -> (i32, i32, i32) {
    %c0_i32 = arith.constant 0 : i32
    %c0_i32_0 = arith.constant 0 : i32
    %c0_i32_1 = arith.constant 0 : i32
    return %arg0, %c0_i32, %c0_i32_0 : i32, i32, i32
  }
  func.func @transform_1(%arg0: i32) -> (i32, i32, i32) {
    %c0_i32 = arith.constant 0 : i32
    %c0_i32_0 = arith.constant 0 : i32
    %c0_i32_1 = arith.constant 0 : i32
    return %arg0, %c0_i32, %c0_i32_0 : i32, i32, i32
  }
  func.func @transform_2(%arg0: i32) -> (i32, i32) {
    %c0_i32 = arith.constant 0 : i32
    %c0_i32_0 = arith.constant 0 : i32
    %c0_i32_1 = arith.constant 0 : i32
    return %c0_i32, %c0_i32_0 : i32, i32
  }
  func.func @transform_3(%arg0: i32) -> (i32, i32) {
    %c0_i32 = arith.constant 0 : i32
    %c0_i32_0 = arith.constant 0 : i32
    %c0_i32_1 = arith.constant 0 : i32
    return %c0_i32, %c0_i32_0 : i32, i32
  }
  func.func @transform_4(%arg0: i32) -> (i32, i32) {
    %c0_i32 = arith.constant 0 : i32
    %c0_i32_0 = arith.constant 0 : i32
    %c0_i32_1 = arith.constant 0 : i32
    return %c0_i32, %c0_i32_0 : i32, i32
  }
  func.func @transform_5(%arg0: i32) -> (i32, i32) {
    %c0_i32 = arith.constant 0 : i32
    %c0_i32_0 = arith.constant 0 : i32
    %c0_i32_1 = arith.constant 0 : i32
    return %c0_i32, %c0_i32_0 : i32, i32
  }
  func.func @transform_6(%arg0: i32) -> (i32, i32) {
    %c0_i32 = arith.constant 0 : i32
    %c0_i32_0 = arith.constant 0 : i32
    %c0_i32_1 = arith.constant 0 : i32
    return %c0_i32, %c0_i32_0 : i32, i32
  }
  func.func @transform_7(%arg0: i32) -> (i32, i32) {
    %c0_i32 = arith.constant 0 : i32
    %c0_i32_0 = arith.constant 0 : i32
    %c0_i32_1 = arith.constant 0 : i32
    return %c0_i32, %c0_i32_0 : i32, i32
  }
  func.func @transform_8(%arg0: i32) -> (i32, i32) {
    %c0_i32 = arith.constant 0 : i32
    %c0_i32_0 = arith.constant 0 : i32
    %c0_i32_1 = arith.constant 0 : i32
    return %c0_i32, %c0_i32_0 : i32, i32
  }
  func.func @transform_9(%arg0: i32) -> (i32, i32) {
    %c0_i32 = arith.constant 0 : i32
    %c0_i32_0 = arith.constant 0 : i32
    %c0_i32_1 = arith.constant 0 : i32
    return %c0_i32, %c0_i32_0 : i32, i32
  }
  func.func @transform_10(%arg0: i32) -> (i32, i32, i32) {
    %c0_i32 = arith.constant 0 : i32
    %c0_i32_0 = arith.constant 0 : i32
    %c0_i32_1 = arith.constant 0 : i32
    return %arg0, %c0_i32, %c0_i32_0 : i32, i32, i32
  }
}

</mosaic_0001>

<bundles_post_ra>
// kernel: tpu_custom_call.1
= control target key start
LH: loop header
LB: loop body
LE: loop exit
PB: predicated region body
PF: predicated region fallthrough
CT: control target
= control target key end

     0   :  { %s1846_s0 = inlined_call_operand.hbm [shape: f32[2,4,256], index: 0, kind: input, shape index: {}]   ;;  %s1847_s1 = inlined_call_operand.vmem [shape: f32[2,4,256], index: 1, kind: input, shape index: {}]   ;;  %s1848_s2 = inlined_call_operand.vmem [shape: s32[1,256], index: 2, kind: input, shape index: {}]   ;;  %s1849_s3 = inlined_call_operand.hbm [shape: s32[1,256], index: 3, kind: input, shape index: {}]   ;;  %s1850_s4 = inlined_call_operand.vmem [shape: f32[4,72], index: 4, kind: input, shape index: {}]   ;;  %s1851_s5 = inlined_call_operand.vmem [shape: f32[4,1], index: 5, kind: input, shape index: {}]   ;;  %s1852_s6 = inlined_call_operand.vmem [shape: f32[4,4], index: 6, kind: input, shape index: {}]   ;;  %s1853_s7 = inlined_call_operand.vmem [shape: f32[4,1], index: 7, kind: input, shape index: {}]   ;;  %s1854_s8 = inlined_call_operand.vmem [shape: f32[4,4], index: 8, kind: input, shape index: {}]   ;;  %s1855_s9 = inlined_call_operand.vmem [shape: f32[4,1], index: 9, kind: input, shape index: {}]   ;;  %s1856_s10 = inlined_call_operand.hbm [shape: f32[2,4,256], index: 10, kind: output, shape index: {}]  }
   0x1   :  { %1862 = sst [smem:[#allocation13_spill]] %s1849_s3 }
   0x2   :  { %15 = vsyncpa [#allocation4], 0 }
   0x3   :  { %17 = vsyncpa [#allocation4 + $0x1], 0 }
   0x4   :  { %18 = vsyncpa [#allocation7], 0 }
   0x5   :  { %19 = vsyncpa [#allocation5], 0 }
   0x6   :  { %21 = vsyncpa [#allocation5 + $0x1], 0  ;;  %s1480_s13 = smov 0   ;;  %s1482_s14 = smov 0  }
   0x7   :  { %s1484_s15 = smov 0   ;;  %s1486_s16 = smov 0  }
   0x8 LB: > { %s1501_s17 = sadd.s32 4294967295, %s1410_s16   ;;  %s1159_s18 = sadd.s32 4294967294, %s1410_s16   ;;  %s1410_s16 = sphi %s1486_s16, %s1882_s16   ;;  %s1406_s15 = sphi %s1484_s15, %s1885_s15   ;;  %s1402_s14 = sphi %s1482_s14, %s1884_s14   ;;  %s1398_s13 = sphi %s1480_s13, %s1883_s13  }
   0x9   : > { %p47_p0 = scmp.ne.s32.totalorder %s1402_s14, %s1398_s13  ;;  %p1859_p1 = scmp.eq.s32.totalorder %s1501_s17, 0 }
   0xa   : > { %p271_p3 = scmp.eq.s32.totalorder %s1159_s18, 1  ;;  %p1160_p5 = scmp.ge.s32.totalorder %s1410_s16, 1 }
   0xb   : > { %p1510_p4 = por %p1859_p1, %p47_p0  ;;  %p278_p7 = scmp.lt.s32.totalorder %s1410_s16, 3 }
   0xc   : > { %p1515_p6 = por %p271_p3, %p47_p0  ;;  %s1412_s22 = smov [#allocation6]  }
   0xd   : > { %s1863_s19 = scalar_select %p1510_p4, 1, 0 }
   0xe   : > { %s1864_s20 = scalar_select %p1515_p6, 1, 0 }
   0xf   : > { %p1520_p8 = pnand %p1160_p5, %p278_p7  ;;  %s294_s23 = sshll.u32 %s1412_s22, 4  ;;  %s295_s23 = int_to_ptr.vmem [resolvable:$true] %s294_s23 }
  0x10   : > { %s1528_s24 = sadd.s32 1, %s1410_s16   ;;  %s34_s28 = sadd.s32 1, %s1406_s15 }
  0x11   : > { %s1865_s21 = scalar_select %p1520_p8, 1, 0 }
  0x12   : > { %p1211_p10 = pneg %p1520_p8  ;;  %1866 = sst [smem:[#allocation12_spill]] %s1528_s24 }
  0x13   : > { %s31_s26 = ssub.s32 %s1410_s16, %s1528_s24  ;;  %s1869_s3 = sld [smem:[#allocation13_spill]] }
  0x14   : > { %p1532_p11 = pnand %p1211_p10, %p1859_p1  ;;  %p1538_p12 = scmp.eq.s32.totalorder %s31_s26, 0 }
  0x16   : > { %s1868_s27 = scalar_select %p1538_p12, 1, 0 }
  0x17   : > { %p1284_p3 = pneg %p1532_p11 }
  0x19   : > { %s1282_s11 = scalar_lea.hbm %s1869_s3, 32 }
  0x1a   : > { %p1283_p0 = scmp.ne.s32.totalorder %s1869_s3, %s1282_s11  ;;  %p1289_p10 = scmp.lt.u32.totalorder %s1282_s11, %s1869_s3 }
  0x1c   : > { %p1285_p5 = pnand %p1284_p3, %p1283_p0 }
  0x1e   : > { %p1286_p7 = pneg %p1285_p5 }
  0x20   : > { %p1291_p9 = pnand %p1289_p10, %p1286_p7 }
  0x22   : > { %1294 = shalt.err (!%p1291_p9)
}
  0x23   : > { %s1295_s26 = scalar_lea.vmem %s295_s23, 32  ;;  %p1303_p6 = scmp.lt.s32.totalorder %s295_s23, %s295_s23 }
  0x24   : > { %p1296_p1 = scmp.ne.s32.totalorder %s295_s23, %s1295_s26  ;;  %p1304_p4 = scmp.lt.s32.totalorder %s1295_s26, %s1295_s26 }
  0x26   : > { %p1298_p2 = pnand %p1296_p1, %p1284_p3  ;;  %p1305_p8 = por %p1304_p4, %p1303_p6 }
  0x28   : > { %p1299_p13 = pneg %p1298_p2 }
  0x2a   : > { %p1306_p12 = pnand %p1305_p8, %p1299_p13 }
  0x2c   : > { %1309 = shalt.err (!%p1306_p12)
}
  0x2d   : > { %1214 = dma.hbm_to_vmem [thread:$0]  (!%p1532_p11), %s1869_s3, 32, %s295_s23, [#allocation7]  }
  0x2e   : > { %p1870_p1 = scmp.ne.s32.totalorder %s1868_s27, 0  ;;  %p42_p2 = scmp.eq.s32.totalorder %s1410_s16, 0 }
  0x2f   : > { %p1871_p4 = scmp.ne.s32.totalorder %s1406_s15, %s1402_s14  ;;  %p1872_p6 = scmp.eq.s32.totalorder %s1501_s17, 1 }
  0x30   : > { %s1564_s24 = scalar_select %p1870_p1, %s1406_s15, %s34_s28  }
  0x31   : > { %p1572_p8 = por %p1872_p6, %p1871_p4  ;;  %p1224_p9 = scmp.lt.s32.totalorder %s1410_s16, 2 }
  0x32   : > { %s323_s11 = sand.u32 1, %s1406_s15   ;;  %p1874_p12 = pmov %p1871_p4 }
  0x33   : > { %s1163_s12 = sshll.u32 %s323_s11, 3  ;;  %s1184_s18 = sshll.u32 %s1410_s16, 7 }
  0x34   : > { %p43_p13 = por %p42_p2, %p1874_p12  ;;  %s1585_s23 = scalar_lea.hbm %s1846_s0, %s1184_s18 }
  0x35   : > { %s327_s27 = scalar_lea.vmem [#allocation3], %s1163_s12  ;;  %s324_s30 = scalar_lea.sflag [#allocation4], %s323_s11 }
  0x36   : > { %s335_s28 = sshll.u32 %s327_s27, 4  ;;  %p1587_p11 = pnand %p1224_p9, %p43_p13  ;;  %s1591_s28 = int_to_ptr.vmem [resolvable:$true] %s335_s28 }
  0x37   : > { %s1310_s3 = scalar_lea.hbm %s1585_s23, 128  ;;  %s1315_s22 = scalar_lea.hbm %s1846_s0, 256 }
  0x38   : > { %p1311_p0 = scmp.ne.s32.totalorder %s1585_s23, %s1310_s3  ;;  %p1312_p3 = pneg %p1587_p11 }
  0x39   : > { %p1316_p10 = scmp.lt.u32.totalorder %s1585_s23, %s1846_s0  ;;  %p1317_p1 = scmp.lt.u32.totalorder %s1315_s22, %s1310_s3 }
  0x3a   : > { %p1313_p5 = pnand %p1312_p3, %p1311_p0  ;;  %p1319_p4 = scmp.lt.u32.totalorder %s1310_s3, %s1585_s23 }
  0x3b   : > { %p1318_p2 = por %p1317_p1, %p1316_p10 }
  0x3c   : > { %p1314_p7 = pneg %p1313_p5 }
  0x3d   : > { %p1320_p6 = por %p1319_p4, %p1318_p2 }
  0x3f   : > { %p1321_p9 = pnand %p1320_p6, %p1314_p7 }
  0x41   : > { %1324 = shalt.err (!%p1321_p9)
}
  0x42   : > { %s1325_s11 = scalar_lea.vmem %s1591_s28, 128  ;;  %s1413_s18 = smov [#allocation3]  }
  0x43   : > { %p1326_p12 = scmp.ne.s32.totalorder %s1591_s28, %s1325_s11  ;;  %s1330_s12 = sshll.u32 %s1413_s18, 4  ;;  %s1331_s12 = int_to_ptr.vmem [resolvable:$false] %s1330_s12 }
  0x44   : > { %s1332_s26 = scalar_lea.vmem %s1331_s12, 256  ;;  %p1333_p5 = scmp.lt.s32.totalorder %s1591_s28, %s1331_s12 }
  0x45   : > { %p1328_p13 = pnand %p1326_p12, %p1312_p3  ;;  %p1334_p10 = scmp.lt.s32.totalorder %s1332_s26, %s1325_s11 }
  0x47   : > { %p1329_p0 = pneg %p1328_p13  ;;  %p1335_p1 = por %p1334_p10, %p1333_p5 }
  0x49   : > { %p1336_p2 = pnand %p1335_p1, %p1329_p0 }
  0x4b   : > { %1339 = shalt.err (!%p1336_p2)
}
  0x4c   : > { %1218 = dma.hbm_to_vmem [thread:$0]  (!%p1587_p11), %s1585_s23, 128, %s1591_s28, %s324_s30  }
  0x4d   : > { %p1876_p7 = scmp.ne.s32.totalorder %s1865_s21, 0 }
  0x4e   : > { %s1621_s3 = sand.u32 (!%p1876_p7), 1, %s1402_s14   ;;  %p1877_p3 = scmp.ne.s32.totalorder (!%p1876_p7), %s1863_s19, 0 }
  0x4f   : > { %352 = sbr.rel (%p1876_p7) target bundleno = 1133 (0x46d), region = 60  ;;  %s1167_s22 = sshll.u32 (!%p1876_p7), %s1621_s3, 3 }
  0x50   : > { %s355_s27 = scalar_lea.sflag (!%p1876_p7), [#allocation4], %s1621_s3  ;;  %s358_s11 = scalar_lea.vmem (!%p1876_p7), [#allocation3], %s1167_s22 }
  0x56   : > { %1385 = dma.done.wait (%p1877_p3), %s355_s27, 128  }
  0x57   : > { %1387 = vsyncadd (%p1877_p3), %s355_s27, 4294967168  ;;  %p1878_p11 = scmp.eq.s32.totalorder %s1501_s17, 0 }
  0x59   : > { %1389 = dma.done.wait (%p1878_p11), [#allocation7], 32   ;;  %p1879_p4 = pmov %p1878_p11 }
  0x5a   : > { %p404_p6 = scmp.lt.s32.totalorder %s1501_s17, 1  ;;  %v1414_v0 = vmov 0.0   ;;  %v409_v2 = vld [vmem:[%s358_s11] sm:$0xff]  ;;  %s1415_s30 = smov 16   ;;  %v1423_v6 = vmov 0   ;;  %v420_v10 = vlaneseq }
  0x5b   : > { %1391 = vsyncadd (%p1879_p4), [#allocation7], 4294967264  ;;  %840 = vmatprep.mubr.f32.mxu0 %v1414_v0  ;;  %935 = vmatprep.mubr.f32.mxu1 %v1414_v0  ;;  %s1416_s18 = smov 17   ;;  %582 = vst [vmem:[#allocation2 + $0x40] sm:$0xf] %v409_v2  ;;  %v414_v4 = vcombine.high %v409_v2, %v409_v2  ;;  %s1417_s12 = smov 15  }
  0x5c   : > { %s405_s21 = scalar_select %p404_p6, %s1501_s17, 1  ;;  %1270 = vset.pattern.permute.xlu0 %v1423_v6  ;;  %v766_v7 = vld [vmem:[%s1851_s5] sm:$0xf]  ;;  %v440_v12 = vshrl.u32 %v420_v10, 7  ;;  %v1660_v14 = vand.u32 127, %v420_v10 }
  0x5d   : > { %583 = vst [vmem:[#allocation2 + $0x48] sm:$0xf] %v414_v4  ;;  %s1418_s26 = smov 1   ;;  %s1419_s27 = smov 127   ;;  %v858_v8 = vld [vmem:[%s1853_s7] sm:$0xf] }
  0x5e   : > { %s1185_s23 = sshll.u32 %s405_s21, 3  ;;  %s1420_s11 = smov 113   ;;  %v945_v9 = vld [vmem:[%s1855_s9] sm:$0xf]  ;;  %v1662_v15 = vsub.s32 0, %v440_v12  ;;  %v1664_v16 = vsub.s32 1, %v440_v12 }
  0x5f   : > { %s408_s19 = scalar_lea.vmem %s1847_s1, %s1185_s23  ;;  %s1421_s21 = smov 112   ;;  %v1654_v11 = vld [vmem:[%s1848_s2] sm:$0x3]  ;;  %vm467_vm3 = vcmp.lt.s32.totalorder %v1660_v14, 16  ;;  %vm422_vm4 = vcmp.lt.s32.totalorder %v1660_v14, 17  ;;  %vm506_vm7 = vcmp.lt.s32.totalorder %v1660_v14, 15 }
  0x60   : > { %v410_v1 = vld [vmem:[%s408_s19] sm:$0xff]  ;;  %s1422_s23 = smov 111   ;;  %vm434_vm0 = vcmp.ge.s32.totalorder %v1654_v11, 1  ;;  %vm547_vm8 = vcmp.lt.s32.totalorder %v1660_v14, 1  ;;  %vm592_vm9 = vcmp.lt.s32.totalorder %v1660_v14, 127  ;;  %vm640_vm10 = vcmp.lt.s32.totalorder %v1654_v11, 15 }
  0x61   : > { %470 = vrot.lane.b32.xlu1 %v410_v1, %s1415_s30  ;;  %587 = vst [vmem:[#allocation2 + $0x48] sm:$0xf0] %v410_v1  ;;  %428 = vrot.lane.b32.xlu0 %v410_v1, %s1416_s18  ;;  %v426_v3 = vcombine.high %v410_v1, %v410_v1  ;;  %v584_v5 = vcombine.low %v410_v1, %v410_v1  ;;  %v1656_v13 = vld [vmem:[#allocation6] sm:$0x3]  ;;  %v476_v17 = vsel %vm434_vm0, 1.0, %v1414_v0  ;;  %vm631_vm12 = vcmp.lt.s32.totalorder %v1660_v14, 113 }
  0x62   : > { %vm435_vm1 = vcmp.ge.s32.totalorder %v1656_v13, 1  ;;  %v481_v20 = vrot.slane %v476_v17, %v1662_v15  ;;  %v485_v21 = vrot.slane %v476_v17, %v1664_v16  ;;  %vm515_vm5 = vcmp.lt.s32.totalorder %v1656_v13, 15 }
  0x63   : > { %586 = vst [vmem:[#allocation2 + $0x40] sm:$0xf0] %v584_v5  ;;  %vm436_vm2 = vmand %vm434_vm0, %vm435_vm1  ;;  %v556_v54 = vsel %vm435_vm1, 1.0, %v1414_v0  ;;  %vm672_vm13 = vcmp.lt.s32.totalorder %v1660_v14, 112  ;;  %vm711_vm15 = vcmp.lt.s32.totalorder %v1660_v14, 111 }
  0x64   : > { %v437_v22 = vsel %vm436_vm2, 1.0, %v1414_v0  ;;  %vm516_vm6 = vmand %vm434_vm0, %vm515_vm5  ;;  %v561_v61 = vrot.slane %v556_v54, %v1662_v15  ;;  %v565_v62 = vrot.slane %v556_v54, %v1664_v16  ;;  %v747_v14 = vld [vmem:[%s1850_s4] sm:$0xf]  ;;  %vm772_vm0 = vcmask 588800  }
  0x65   : > { %472 = vrot.lane.b32.xlu1 %v426_v3, %s1415_s30  ;;  %416 = vrot.lane.b32.xlu0 %v409_v2, %s1416_s18  ;;  %v442_v29 = vrot.slane %v437_v22, %v1662_v15  ;;  %v446_v30 = vrot.slane %v437_v22, %v1664_v16  ;;  %v517_v43 = vsel %vm516_vm6, 1.0, %v1414_v0  ;;  %vm641_vm11 = vmand %vm640_vm10, %vm435_vm1  ;;  %vm849_vm1 = vcmask 1043456  }
  0x66   : > { %v522_v52 = vrot.slane %v517_v43, %v1662_v15  ;;  %v526_v53 = vrot.slane %v517_v43, %v1664_v16  ;;  %vm720_vm14 = vmand %vm640_vm10, %vm515_vm5  ;;  %vm865_vm2 = vcmask 31744  }
  0x69   : > { %430 = vrot.lane.b32.xlu0 %v426_v3, %s1416_s18  ;;  %418 = vrot.lane.b32.xlu1 %v414_v4, %s1416_s18  ;;  %s403_s18 = scalar_lea.vmem [#allocation8], %s1167_s22 }
  0x6d   : > { %463 = vrot.lane.b32.xlu0 %v409_v2, %s1415_s30  ;;  %465 = vrot.lane.b32.xlu1 %v414_v4, %s1415_s30  ;;  %s1186_s30 = sshll.u32 %s1501_s17, 7  ;;  %s1424_s17 = smov [#allocation8]  }
  0x6e   : > { %s1344_s22 = sshll.u32 %s1424_s17, 4  ;;  %s1345_s22 = int_to_ptr.vmem [resolvable:$false] %s1344_s22 }
  0x6f   : > { %s1346_s28 = scalar_lea.vmem %s1345_s22, 256 }
  0x71   : > { %509 = vrot.lane.b32.xlu0 %v410_v1, %s1417_s12  ;;  %511 = vrot.lane.b32.xlu1 %v426_v3, %s1417_s12 }
  0x75   : > { %550 = vrot.lane.b32.xlu0 %v410_v1, %s1418_s26  ;;  %552 = vrot.lane.b32.xlu1 %v426_v3, %s1418_s26 }
  0x79   : > { %502 = vrot.lane.b32.xlu0 %v409_v2, %s1417_s12  ;;  %504 = vrot.lane.b32.xlu1 %v414_v4, %s1417_s12  ;;  %s1067_s12 = sshll.u32 %s403_s18, 4  ;;  %s1804_s12 = int_to_ptr.vmem [resolvable:$true] %s1067_s12 }
  0x7a   : > { %p1347_p0 = scmp.lt.s32.totalorder %s1804_s12, %s1345_s22 }
  0x7d   : > { %543 = vrot.lane.b32.xlu0 %v409_v2, %s1418_s26  ;;  %545 = vrot.lane.b32.xlu1 %v414_v4, %s1418_s26 }
  0x81   : > { %595 = vrot.lane.b32.xlu0 %v410_v1, %s1419_s27  ;;  %597 = vrot.lane.b32.xlu1 %v426_v3, %s1419_s27 }
  0x85   : > { %588 = vrot.lane.b32.xlu0 %v409_v2, %s1419_s27  ;;  %590 = vrot.lane.b32.xlu1 %v414_v4, %s1419_s27 }
  0x89   : > { %634 = vrot.lane.b32.xlu0 %v410_v1, %s1420_s11  ;;  %636 = vrot.lane.b32.xlu1 %v426_v3, %s1420_s11 }
  0x8d   : > { %675 = vrot.lane.b32.xlu0 %v410_v1, %s1421_s21  ;;  %677 = vrot.lane.b32.xlu1 %v426_v3, %s1421_s21 }
  0x91   : > { %627 = vrot.lane.b32.xlu0 %v409_v2, %s1420_s11  ;;  %629 = vrot.lane.b32.xlu1 %v414_v4, %s1420_s11  ;;  %s1802_s11 = scalar_lea.hbm %s1856_s10, %s1186_s30 }
  0x95   : > { %668 = vrot.lane.b32.xlu0 %v409_v2, %s1421_s21  ;;  %670 = vrot.lane.b32.xlu1 %v414_v4, %s1421_s21  ;;  %s1053_s21 = scalar_lea.sflag [#allocation5], %s1621_s3 }
  0x99   : > { %714 = vrot.lane.b32.xlu0 %v410_v1, %s1422_s23  ;;  %716 = vrot.lane.b32.xlu1 %v426_v3, %s1422_s23 }
  0x9d   : > { %707 = vrot.lane.b32.xlu0 %v409_v2, %s1422_s23  ;;  %709 = vrot.lane.b32.xlu1 %v414_v4, %s1422_s23  ;;  %s1340_s23 = scalar_lea.vmem %s1804_s12, 128 }
  0x9e   : > { %p1341_p9 = scmp.ne.s32.totalorder %s1804_s12, %s1340_s23  ;;  %p1348_p5 = scmp.lt.s32.totalorder %s1346_s28, %s1340_s23 }
  0xa0   : > { %p1342_p12 = pnand %p1341_p9, %p1572_p8  ;;  %p1349_p10 = por %p1348_p5, %p1347_p0 }
  0xa1   : > { %769 = vperm.xlu0 %1270, %v766_v7  }
  0xa2   : > { %p1343_p13 = pneg %p1342_p12 }
  0xa4   : > { %p1350_p1 = pnand %p1349_p10, %p1343_p13 }
  0xa5   : > { %861 = vperm.xlu0 %1270, %v858_v8  }
  0xa9   : > { %948 = vperm.xlu0 %1270, %v945_v9  }
  0xd3   : > { %v471_v18 = vpop.permute.xlu1 %470  ;;  %v429_v19 = vpop.permute.xlu0 %428 }
  0xd7   : > { %v473_v23 = vpop.permute.xlu1 %472  ;;  %v417_v24 = vpop.permute.xlu0 %416 }
  0xd8   : > { %v474_v25 = vsel %vm467_vm3, %v471_v18, %v473_v23  ;;  %v475_v26 = vsel %vm467_vm3, %v473_v23, %v471_v18 }
  0xd9   : > { %v490_v27 = vmul.f32 %v481_v20, %v475_v26  ;;  %v491_v28 = vmul.f32 %v485_v21, %v474_v25 }
  0xdb   : > { %v496_v31 = vrot.slane %v490_v27, 4  ;;  %v497_v32 = vrot.slane %v491_v28, 4  ;;  %v431_v33 = vpop.permute.xlu0 %430  ;;  %v419_v34 = vpop.permute.xlu1 %418  ;;  %v601_v27 = vsel %vm515_vm5, 1.0, %v1414_v0 }
  0xdc   : > { %v432_v35 = vsel %vm422_vm4, %v429_v19, %v431_v33  ;;  %v433_v36 = vsel %vm422_vm4, %v431_v33, %v429_v19  ;;  %v423_v37 = vsel %vm422_vm4, %v417_v24, %v419_v34  ;;  %v424_v38 = vsel %vm422_vm4, %v419_v34, %v417_v24 }
  0xdd   : > { %500 = vst [vmem:[#allocation2 + $0x10] sm:$0xf0] %v496_v31  ;;  %501 = vst [vmem:[#allocation2 + $0x18] sm:$0xf0] %v497_v32  ;;  %v451_v39 = vmul.f32 %v442_v29, %v433_v36  ;;  %v452_v40 = vmul.f32 %v446_v30, %v432_v35  ;;  %v449_v41 = vmul.f32 %v442_v29, %v424_v38 }
  0xde   : > { %v450_v42 = vmul.f32 %v446_v30, %v423_v37  ;;  %v606_v34 = vrot.slane %v601_v27, %v1662_v15  ;;  %v610_v35 = vrot.slane %v601_v27, %v1664_v16 }
  0xdf   : > { %v457_v44 = vrot.slane %v451_v39, 4  ;;  %v458_v45 = vrot.slane %v452_v40, 4  ;;  %453 = vst [vmem:[#allocation2] sm:$0xf] %v449_v41  ;;  %v464_v46 = vpop.permute.xlu0 %463  ;;  %v466_v47 = vpop.permute.xlu1 %465 }
  0xe0   : > { %454 = vst [vmem:[#allocation2 + $0x8] sm:$0xf] %v450_v42  ;;  %v468_v48 = vsel %vm467_vm3, %v464_v46, %v466_v47  ;;  %v469_v49 = vsel %vm467_vm3, %v466_v47, %v464_v46  ;;  %v642_v42 = vsel %vm641_vm11, 1.0, %v1414_v0 }
  0xe1   : > { %461 = vst [vmem:[#allocation2] sm:$0xf0] %v457_v44  ;;  %462 = vst [vmem:[#allocation2 + $0x8] sm:$0xf0] %v458_v45  ;;  %v488_v50 = vmul.f32 %v481_v20, %v469_v49  ;;  %v489_v51 = vmul.f32 %v485_v21, %v468_v48 }
  0xe3   : > { %492 = vst [vmem:[#allocation2 + $0x10] sm:$0xf] %v488_v50  ;;  %493 = vst [vmem:[#allocation2 + $0x18] sm:$0xf] %v489_v51  ;;  %v510_v55 = vpop.permute.xlu0 %509  ;;  %v512_v56 = vpop.permute.xlu1 %511  ;;  %v647_v51 = vrot.slane %v642_v42, %v1662_v15 }
  0xe4   : > { %v513_v57 = vsel %vm506_vm7, %v510_v55, %v512_v56  ;;  %v514_v58 = vsel %vm506_vm7, %v512_v56, %v510_v55 }
  0xe5   : > { %v531_v59 = vmul.f32 %v522_v52, %v514_v58  ;;  %v532_v60 = vmul.f32 %v526_v53, %v513_v57  ;;  %v681_v57 = vsel %vm640_vm10, 1.0, %v1414_v0 }
  0xe7   : > { %v537_v63 = vrot.slane %v531_v59, 4  ;;  %v538_v1 = vrot.slane %v532_v60, 4  ;;  %v551_v2 = vpop.permute.xlu0 %550  ;;  %v553_v3 = vpop.permute.xlu1 %552 }
  0xe8   : > { %v554_v4 = vsel %vm547_vm8, %v551_v2, %v553_v3  ;;  %v555_v5 = vsel %vm547_vm8, %v553_v3, %v551_v2  ;;  %v749_v8 = vld [vmem:[#allocation2 + $0x8] sm:$0xff]  ;;  %v748_v10 = vld [vmem:[#allocation2] sm:$0xff]  ;;  %v686_v3 = vrot.slane %v681_v57, %v1662_v15 }
  0xe9   : > { %541 = vst [vmem:[#allocation2 + $0x20] sm:$0xf0] %v537_v63  ;;  %542 = vst [vmem:[#allocation2 + $0x28] sm:$0xf0] %v538_v1  ;;  %v570_v6 = vmul.f32 %v561_v61, %v555_v5  ;;  %v571_v7 = vmul.f32 %v565_v62, %v554_v4  ;;  %v690_v4 = vrot.slane %v681_v57, %v1664_v16 }
  0xea   : > { %v751_v9 = vld [vmem:[#allocation2 + $0x18] sm:$0xff]  ;;  %v750_v12 = vld [vmem:[#allocation2 + $0x10] sm:$0xff] }
  0xeb   : > { %v576_v17 = vrot.slane %v570_v6, 4  ;;  %v577_v18 = vrot.slane %v571_v7, 4  ;;  %v503_v19 = vpop.permute.xlu0 %502  ;;  %v505_v20 = vpop.permute.xlu1 %504  ;;  %v1187_v21 = vpack.c.bf16 %v751_v9, %v749_v8  ;;  %v1189_v22 = vpack.c.bf16 %v750_v12, %v748_v10  ;;  %v757_v12 = vld [vmem:[#allocation2 + $0x48] sm:$0xff] }
  0xec   : > { %v507_v23 = vsel %vm506_vm7, %v503_v19, %v505_v20  ;;  %v508_v24 = vsel %vm506_vm7, %v505_v20, %v503_v19 }
  0xed   : > { %580 = vst [vmem:[#allocation2 + $0x30] sm:$0xf0] %v576_v17  ;;  %581 = vst [vmem:[#allocation2 + $0x38] sm:$0xf0] %v577_v18  ;;  %v529_v25 = vmul.f32 %v522_v52, %v508_v24  ;;  %v530_v26 = vmul.f32 %v526_v53, %v507_v23  ;;  %1188 = vmatprep.subr.bf16.mxu0 %v1187_v21  ;;  %v651_v52 = vrot.slane %v642_v42, %v1664_v16  ;;  %v756_v17 = vld [vmem:[#allocation2 + $0x40] sm:$0xff] }
  0xee   : > { %1190 = vmatpush1.bf16.msra.mxu0 %v1189_v22 }
  0xef   : > { %533 = vst [vmem:[#allocation2 + $0x20] sm:$0xf] %v529_v25  ;;  %534 = vst [vmem:[#allocation2 + $0x28] sm:$0xf] %v530_v26  ;;  %v544_v28 = vpop.permute.xlu0 %543  ;;  %v546_v29 = vpop.permute.xlu1 %545 }
  0xf0   : > { %v548_v30 = vsel %vm547_vm8, %v544_v28, %v546_v29  ;;  %v549_v31 = vsel %vm547_vm8, %v546_v29, %v544_v28 }
  0xf1   : > { %v568_v32 = vmul.f32 %v561_v61, %v549_v31  ;;  %v569_v33 = vmul.f32 %v565_v62, %v548_v30 }
  0xf3   : > { %572 = vst [vmem:[#allocation2 + $0x30] sm:$0xf] %v568_v32  ;;  %573 = vst [vmem:[#allocation2 + $0x38] sm:$0xf] %v569_v33  ;;  %v596_v36 = vpop.permute.xlu0 %595  ;;  %v598_v37 = vpop.permute.xlu1 %597  ;;  %v721_v32 = vsel %vm720_vm14, 1.0, %v1414_v0 }
  0xf4   : > { %v599_v38 = vsel %vm592_vm9, %v596_v36, %v598_v37  ;;  %v600_v39 = vsel %vm592_vm9, %v598_v37, %v596_v36  ;;  %v726_v37 = vrot.slane %v721_v32, %v1662_v15 }
  0xf5   : > { %v615_v40 = vmul.f32 %v606_v34, %v599_v38  ;;  %v616_v41 = vmul.f32 %v610_v35, %v600_v39  ;;  %v730_v38 = vrot.slane %v721_v32, %v1664_v16 }
  0xf6   : > { %v753_v53 = vld [vmem:[#allocation2 + $0x28] sm:$0xff]  ;;  %v752_v55 = vld [vmem:[#allocation2 + $0x20] sm:$0xff] }
  0xf7   : > { %v621_v43 = vrot.slane %v615_v40, 4  ;;  %v622_v44 = vrot.slane %v616_v41, 4  ;;  %v589_v45 = vpop.permute.xlu0 %588  ;;  %v591_v46 = vpop.permute.xlu1 %590 }
  0xf8   : > { %v593_v47 = vsel %vm592_vm9, %v589_v45, %v591_v46  ;;  %v594_v48 = vsel %vm592_vm9, %v591_v46, %v589_v45 }
  0xf9   : > { %625 = vst [vmem:[#allocation2 + $0x50] sm:$0xf0] %v621_v43  ;;  %626 = vst [vmem:[#allocation2 + $0x58] sm:$0xf0] %v622_v44  ;;  %v613_v49 = vmul.f32 %v606_v34, %v593_v47  ;;  %v614_v50 = vmul.f32 %v610_v35, %v594_v48 }
  0xfa   : > { %v755_v54 = vld [vmem:[#allocation2 + $0x38] sm:$0xff]  ;;  %v754_v56 = vld [vmem:[#allocation2 + $0x30] sm:$0xff] }
  0xfb   : > { %617 = vst [vmem:[#allocation2 + $0x50] sm:$0xf] %v613_v49  ;;  %618 = vst [vmem:[#allocation2 + $0x58] sm:$0xf] %v614_v50  ;;  %v635_v58 = vpop.permute.xlu0 %634  ;;  %v637_v59 = vpop.permute.xlu1 %636  ;;  %v1191_v60 = vpack.c.bf16 %v755_v54, %v753_v53  ;;  %v1193_v61 = vpack.c.bf16 %v754_v56, %v752_v55 }
  0xfc   : > { %v638_v62 = vsel %vm631_vm12, %v635_v58, %v637_v59  ;;  %v639_v63 = vsel %vm631_vm12, %v637_v59, %v635_v58 }
  0xfd   : > { %v656_v1 = vmul.f32 %v647_v51, %v638_v62  ;;  %v657_v2 = vmul.f32 %v651_v52, %v639_v63  ;;  %1192 = vmatprep.subr.bf16.mxu0 %v1191_v60 }
  0xfe   : > { %1194 = vmatpush1.bf16.msra.mxu0 %v1193_v61 }
  0xff   : > { %v662_v5 = vrot.slane %v656_v1, 4  ;;  %v663_v6 = vrot.slane %v657_v2, 4  ;;  %v676_v7 = vpop.permute.xlu0 %675  ;;  %v678_v8 = vpop.permute.xlu1 %677 }
 0x100   : > { %v679_v9 = vsel %vm672_vm13, %v676_v7, %v678_v8  ;;  %v680_v10 = vsel %vm672_vm13, %v678_v8, %v676_v7  ;;  %v857_v8 = vld [vmem:[%s1852_s6] sm:$0xf] }
 0x101   : > { %666 = vst [vmem:[#allocation2 + $0x60] sm:$0xf0] %v662_v5  ;;  %667 = vst [vmem:[#allocation2 + $0x68] sm:$0xf0] %v663_v6  ;;  %v695_v18 = vmul.f32 %v686_v3, %v679_v9  ;;  %v696_v19 = vmul.f32 %v690_v4, %v680_v10 }
 0x102   : > { %v759_v20 = vld [vmem:[#allocation2 + $0x58] sm:$0xff]  ;;  %v758_v21 = vld [vmem:[#allocation2 + $0x50] sm:$0xff] }
 0x103   : > { %v701_v22 = vrot.slane %v695_v18, 4  ;;  %v702_v23 = vrot.slane %v696_v19, 4  ;;  %v628_v24 = vpop.permute.xlu0 %627  ;;  %v630_v25 = vpop.permute.xlu1 %629  ;;  %v1195_v26 = vpack.c.bf16 %v759_v20, %v757_v12  ;;  %v1197_v27 = vpack.c.bf16 %v758_v21, %v756_v17  ;;  %v944_v21 = vld [vmem:[%s1854_s8] sm:$0xf] }
 0x104   : > { %v632_v28 = vsel %vm631_vm12, %v628_v24, %v630_v25  ;;  %v633_v29 = vsel %vm631_vm12, %v630_v25, %v628_v24 }
 0x105   : > { %705 = vst [vmem:[#allocation2 + $0x70] sm:$0xf0] %v701_v22  ;;  %706 = vst [vmem:[#allocation2 + $0x78] sm:$0xf0] %v702_v23  ;;  %v654_v30 = vmul.f32 %v647_v51, %v632_v28  ;;  %v655_v31 = vmul.f32 %v651_v52, %v633_v29  ;;  %1196 = vmatprep.subr.bf16.mxu0 %v1195_v26 }
 0x106   : > { %1198 = vmatpush1.bf16.msra.mxu0 %v1197_v27 }
 0x107   : > { %658 = vst [vmem:[#allocation2 + $0x60] sm:$0xf] %v654_v30  ;;  %659 = vst [vmem:[#allocation2 + $0x68] sm:$0xf] %v655_v31  ;;  %v669_v13 = vpop.permute.xlu0 %668  ;;  %v671_v33 = vpop.permute.xlu1 %670 }
 0x108   : > { %v673_v11 = vsel %vm672_vm13, %v669_v13, %v671_v33  ;;  %v674_v34 = vsel %vm672_vm13, %v671_v33, %v669_v13 }
 0x109   : > { %v693_v35 = vmul.f32 %v686_v3, %v673_v11  ;;  %v694_v36 = vmul.f32 %v690_v4, %v674_v34 }
 0x10b   : > { %697 = vst [vmem:[#allocation2 + $0x70] sm:$0xf] %v693_v35  ;;  %698 = vst [vmem:[#allocation2 + $0x78] sm:$0xf] %v694_v36  ;;  %v715_v39 = vpop.permute.xlu0 %714  ;;  %v717_v40 = vpop.permute.xlu1 %716 }
 0x10c   : > { %v718_v41 = vsel %vm711_vm15, %v715_v39, %v717_v40  ;;  %v719_v42 = vsel %vm711_vm15, %v717_v40, %v715_v39 }
 0x10d   : > { %v735_v43 = vmul.f32 %v726_v37, %v718_v41  ;;  %v736_v44 = vmul.f32 %v730_v38, %v719_v42 }
 0x10e   : > { %v761_v51 = vld [vmem:[#allocation2 + $0x68] sm:$0xff]  ;;  %v760_v53 = vld [vmem:[#allocation2 + $0x60] sm:$0xff] }
 0x10f   : > { %v741_v45 = vrot.slane %v735_v43, 4  ;;  %v742_v46 = vrot.slane %v736_v44, 4  ;;  %v708_v47 = vpop.permute.xlu0 %707  ;;  %v710_v48 = vpop.permute.xlu1 %709 }
 0x110   : > { %v712_v15 = vsel %vm711_vm15, %v708_v47, %v710_v48  ;;  %v713_v16 = vsel %vm711_vm15, %v710_v48, %v708_v47 }
 0x111   : > { %745 = vst [vmem:[#allocation2 + $0x80] sm:$0xf0] %v741_v45  ;;  %746 = vst [vmem:[#allocation2 + $0x88] sm:$0xf0] %v742_v46  ;;  %v733_v49 = vmul.f32 %v726_v37, %v712_v15  ;;  %v734_v50 = vmul.f32 %v730_v38, %v713_v16 }
 0x112   : > { %v763_v52 = vld [vmem:[#allocation2 + $0x78] sm:$0xff]  ;;  %v762_v54 = vld [vmem:[#allocation2 + $0x70] sm:$0xff] }
 0x113   : > { %737 = vst [vmem:[#allocation2 + $0x80] sm:$0xf] %v733_v49  ;;  %738 = vst [vmem:[#allocation2 + $0x88] sm:$0xf] %v734_v50  ;;  %v1199_v55 = vpack.c.bf16 %v763_v52, %v761_v51  ;;  %v1201_v56 = vpack.c.bf16 %v762_v54, %v760_v53 }
 0x115   : > { %1200 = vmatprep.subr.bf16.mxu0 %v1199_v55 }
 0x116   : > { %1202 = vmatpush1.bf16.msra.mxu0 %v1201_v56 }
 0x11a   : > { %v765_v57 = vld [vmem:[#allocation2 + $0x88] sm:$0xff]  ;;  %v764_v58 = vld [vmem:[#allocation2 + $0x80] sm:$0xff] }
 0x11b   : > { %792 = vmatprep.subr.mxu0 %v765_v57 }
 0x11c   : > { %793 = vmatpush1.msra.mxu0 %v764_v58 }
 0x11d   : > { %1172 = vmatmul.mubr.msk.f32.vlgmr.msra.gmra.mrb[0].mxu0 %vm772_vm0, %v747_v14 }
 0x120   : > { %v770_v59 = vpop.permute.xlu0 %769 }
 0x124   : > { %v862_v9 = vpop.permute.xlu0 %861 }
 0x128   : > { %v949_v22 = vpop.permute.xlu0 %948 }
 0x1f0   : > { %v842_v60 = vpop.f32.mrb[0].mxu0 }
 0x1f1   : > { %v843_v61 = vadd.f32 %v842_v60, %v770_v59  ;;  %v844_v62 = vpop.f32.mrb[1].mxu0 }
 0x1f2   : > { %v845_v63 = vadd.f32 %v844_v62, %v770_v59 }
 0x1f3   : > { %v847_v1 = vmax.f32 %v843_v61, 0.0 }
 0x1f4   : > { %v848_v2 = vmax.f32 %v845_v63, 0.0 }
 0x1f5   : > { %v850_v3 = vsel %vm849_vm1, %v847_v1, 0.0 }
 0x1f6   : > { %v851_v4 = vsel %vm849_vm1, %v848_v2, 0.0 }
 0x1f7   : > { %v852_v5 = vadd.f32 %v851_v4, %v850_v3 }
 0x1f9   : > { %853 = vadd.xlane.f32.xlu1 %v852_v5 }
 0x286   : > { %v854_v6 = vpop.xlane.xlu1 %853 }
 0x287   : > { %v856_v7 = vmul.f32 0.00390625, %v854_v6 }
 0x289   : > { %1173 = vmatprep.subr.msk.mxu1 %vm849_vm1, %v856_v7 }
 0x28a   : > { %1174 = vmatpush1.msk.msra.mxu1 %vm849_vm1, %v856_v7 }
 0x28b   : > { %1175 = vmatmul.mubr.msk.f32.vlgmr.msra.gmra.mrb[0].mxu1 %vm865_vm2, %v857_v8 }
 0x28c   : > { %1024 = vmatprep.mubr.f32.mxu1 %v1414_v0 }
 0x35e   : > { %v937_v10 = vpop.f32.mrb[0].mxu1 }
 0x35f   : > { %v938_v12 = vadd.f32 %v937_v10, %v862_v9  ;;  %v939_v17 = vpop.f32.mrb[1].mxu1 }
 0x360   : > { %v940_v18 = vadd.f32 %v939_v17, %v862_v9 }
 0x361   : > { %v942_v20 = vmax.f32 %v938_v12, 0.0 }
 0x362   : > { %v943_v19 = vmax.f32 %v940_v18, 0.0 }
 0x364   : > { %1176 = vmatprep.subr.msk.mxu1 %vm849_vm1, %v943_v19 }
 0x365   : > { %1177 = vmatpush1.msk.msra.mxu1 %vm849_vm1, %v942_v20 }
 0x366   : > { %1178 = vmatmul.mubr.msk.f32.vlgmr.msra.gmra.mrb[2].mxu1 %vm865_vm2, %v944_v21 }
 0x439   : > { %v1026_v23 = vpop.f32.mrb[2].mxu1 }
 0x43a   : > { %v1027_v24 = vadd.f32 %v1026_v23, %v949_v22  ;;  %v1028_v0 = vpop.f32.mrb[3].mxu1 }
 0x43b   : > { %v1029_v25 = vadd.f32 %v1028_v0, %v949_v22 }
 0x43c   : > { %v1031_v26 = vsub.f32 0.0, %v1027_v24 }
 0x43d   : > { %v1032_v27 = vsub.f32 0.0, %v1029_v25 }
 0x43e   : > { %v1033_v28 = vmul.f32 1.442695, %v1031_v26 }
 0x43f   : > { %v1035_v29 = vmul.f32 1.442695, %v1032_v27 }
 0x440   : > { %1274 = vpow2.f32 %v1033_v28 }
 0x441   : > { %1276 = vpow2.f32 %v1035_v29 }
 0x44a   : > { %v1275_v30 = vpop.eup %1274 }
 0x44b   : > { %v1277_v31 = vpop.eup %1276  ;;  %v1037_v32 = vadd.f32 1.0, %v1275_v30 }
 0x44c   : > { %v1038_v13 = vadd.f32 1.0, %v1277_v31 }
 0x44d   : > { %1278 = vrcp.f32 %v1037_v32 }
 0x44e   : > { %1280 = vrcp.f32 %v1038_v13 }
 0x457   : > { %v1279_v33 = vpop.eup %1278 }
 0x458   : > { %v1281_v11 = vpop.eup %1280  ;;  %v1043_v34 = vadd.f32 1.0, %v1279_v33 }
 0x459   : > { %v1044_v35 = vadd.f32 1.0, %v1281_v11 }
 0x45a   : > { %v1045_v36 = vmul.f32 %v1043_v34, %v847_v1 }
 0x45b   : > { %v1046_v37 = vmul.f32 %v1044_v35, %v848_v2 }
 0x45d   : > { %v1049_v38 = vcombine.low %v1045_v36, %v1046_v37 }
 0x45f   : > { %1051 = vst [vmem:[%s403_s18] sm:$0xff] %v1049_v38 }
 0x460   : > { %1353 = shalt.err (!%p1350_p1)
}
 0x461   : > { %s1354_s3 = scalar_lea.hbm %s1802_s11, 128  ;;  %s1358_s30 = scalar_lea.hbm %s1856_s10, 256 }
 0x462   : > { %p1355_p2 = scmp.ne.s32.totalorder %s1802_s11, %s1354_s3  ;;  %p1359_p11 = scmp.lt.u32.totalorder %s1802_s11, %s1856_s10 }
 0x463   : > { %p1360_p4 = scmp.lt.u32.totalorder %s1358_s30, %s1354_s3  ;;  %p1362_p9 = scmp.lt.u32.totalorder %s1354_s3, %s1802_s11 }
 0x464   : > { %p1356_p7 = pnand %p1355_p2, %p1572_p8 }
 0x465   : > { %p1361_p6 = por %p1360_p4, %p1359_p11 }
 0x466   : > { %p1357_p3 = pneg %p1356_p7 }
 0x467   : > { %p1363_p12 = por %p1362_p9, %p1361_p6 }
 0x469   : > { %p1364_p13 = pnand %p1363_p12, %p1357_p3 }
 0x46b   : > { %1367 = shalt.err (!%p1364_p13)
}
 0x46c   : > { %1209 = dma.vmem_to_hbm [thread:$0]  (%p1572_p8), %s1804_s12, 128, %s1802_s11, %s1053_s21  }
 0x46d PF: > { %s1079_s27 = sand.u32 1, %s1398_s13   ;;  %p1880_p0 = scmp.ne.s32.totalorder %s1864_s20, 0 }
 0x46e   : > { %p1881_p5 = scmp.ge.s32.totalorder %s1410_s16, 2  ;;  %s1080_s23 = scalar_lea.sflag [#allocation5], %s1079_s27 }
 0x470   : > { %p1220_p10 = pnand %p1881_p5, %p1880_p0 }
 0x472   : > { %1393 = dma.done.wait (!%p1220_p10), %s1080_s23, 128  }
 0x473   : > { %1395 = vsyncadd (!%p1220_p10), %s1080_s23, 4294967168  ;;  %s1882_s16 = sld [smem:[#allocation12_spill]]  ;;  %s1883_s13 = smov %s1402_s14 }
 0x474   : > { %s1884_s14 = smov %s1406_s15  ;;  %s1885_s15 = smov %s1564_s24 }
 0x479   : > { %p24_p1 = scmp.ge.s32.totalorder %s1882_s16, 4  }
 0x47b   :  { %26 = sbr.rel (!%p24_p1) target bundleno = 8 (0x8), region = 112 }
 0x482   :  { %1085 = vsyncpa [#allocation4], 1 }
 0x483   :  { %1087 = vsyncpa [#allocation4 + $0x1], 1 }
 0x484   :  { %1088 = vsyncpa [#allocation7], 1 }
 0x485   :  { %1089 = vsyncpa [#allocation5], 1 }
 0x486   :  { %1091 = vsyncpa [#allocation5 + $0x1], 1 }

</bundles_post_ra>
